<compile_context>
chip_gen: v6e
topology: v6e:2x2x1
jax: 0.10.0
libtpu: 0.0.40
codegen_flags: <defaults>
</compile_context>

<pallas_src>
import functools

import jax
import jax.numpy as jnp
from jax.experimental import pallas as pl
from jax.experimental.pallas import tpu as pltpu


# Cody-Waite split of pi (PI_HI has 8 significant bits -> k*PI_HI exact for k < 2^16).
_PI_HI = 3.140625
_PI_LO = 9.676535897932795e-04
_INV_PI = 0.3183098861837907

# Odd Taylor coefficients for sin(y), |y| <= pi/2 (abs error ~1e-7).
_S3 = -1.0 / 6.0
_S5 = 1.0 / 120.0
_S7 = -1.0 / 5040.0
_S9 = 1.0 / 362880.0
_S11 = -1.0 / 39916800.0


def _sin_bounded(x):
    """sin(x) via Cody-Waite range reduction + degree-11 odd polynomial."""
    k = jnp.floor(x * _INV_PI + 0.5)
    y = (x - k * _PI_HI) - k * _PI_LO            # y in [-pi/2, pi/2]
    y2 = y * y
    w = _S11
    w = w * y2 + _S9
    w = w * y2 + _S7
    w = w * y2 + _S5
    w = w * y2 + _S3
    s = y * (w * y2 + 1.0)
    kh = 0.5 * k                                  # (-1)^k without integer ops
    sign = 1.0 - 4.0 * (kh - jnp.floor(kh))
    return sign * s


def _distance_kernel(d_ref, freq_ref, o_ref, *, inv_cutoff, p, a, b, c, chunk):
    # d_ref:    (1, TN)      raw distances, edges on the lane axis
    # freq_ref: (R_pad, 1)   Bessel frequencies (rows padded to a sublane multiple)
    # o_ref:    (R_pad, TN)  lane-dense output tile
    r_pad, tile_n = o_ref.shape
    n_chunks = tile_n // chunk
    fcol = freq_ref[...]                          # hoisted out of the chunk loop

    @pl.loop(0, n_chunks)
    def _(ci):
        off = pl.multiple_of(ci * chunk, chunk)
        d = d_ref[:, pl.ds(off, chunk)] * inv_cutoff              # (1, chunk)

        # Envelope on the (1, chunk) row only (amortized over the R_pad radial rows).
        # approx reciprocal runs on the EUP; one Newton step restores ~1e-7 accuracy.
        # Note: d == 0 yields NaN exactly like the reference (1/0 * sin(0)).
        r0 = pl.reciprocal(d, approx=True)
        rec = r0 * (2.0 - d * r0)
        env = rec + (d ** (p - 1)) * (a + d * (b + c * d))        # Horner form
        env = jnp.where(d < 1.0, env, jnp.zeros_like(env))

        # Clamp the trig argument: wherever we clamp, env == 0, so the result is
        # unchanged -- this also keeps padded lanes (d == 1) finite.
        dt = jnp.minimum(d, 1.0)

        # Full-sublane-occupancy work on the broadcast (R_pad, chunk) tile, then one
        # dense (unmasked) store per chunk.
        x = fcol * dt                                             # (R_pad, chunk)
        o_ref[:, pl.ds(off, chunk)] = env * _sin_bounded(x)


def _round_up(x, m):
    return ((x + m - 1) // m) * m


def distance_layer(distances, frequencies, *, r_cut=5.0, envelope_exponent=5,
                   tile_n=16384, chunk=512, transposed=False):
    """Pallas equivalent of DistanceLayer.forward.

    distances:   (N,) float32
    frequencies: (num_radial,) float32 (trainable parameter; arbitrary values OK)
    returns:     (N, num_radial) float32, or (num_radial, N) if transposed=True
                 (the transposed layout skips the extra HBM pass and is preferred
                 when fusing into a downstream edge-embedding matmul).
    """
    n = distances.shape[0]
    num_radial = frequencies.shape[0]
    dtype = distances.dtype

    p = envelope_exponent + 1
    a = -(p + 1) * (p + 2) / 2.0
    b = float(p * (p + 2))
    c = -p * (p + 1) / 2.0
    inv_cutoff = 1.0 / r_cut

    # --- lane-axis tiling ---------------------------------------------------
    tile = max(128, (int(tile_n) // 128) * 128)
    # Keep >= 2 grid steps when there is enough work so v7x's two TensorCores both
    # get a share of the ("parallel",) grid axis; harmless on single-TC v5e/v6e.
    half = _round_up(pl.cdiv(n, 2), 128)
    tile = min(tile, max(128, half))
    n_lane = _round_up(n, 128)
    tile = min(tile, n_lane)
    # Inner compute chunk bounds vreg pressure; the DMA block stays `tile` wide.
    chunk = max(128, min((int(chunk) // 128) * 128, tile))
    tile = _round_up(tile, chunk)
    n_pad = pl.cdiv(n, tile) * tile
    grid = (n_pad // tile,)

    # Radial rows padded to a full sublane group (multiple of 8) -> dense output tile.
    r_pad = _round_up(num_radial, 8)

    # Pad distances with r_cut (>= cutoff): padded lanes get env == 0, never 1/0.
    # TODO(synk): pass N via scalar prefetch and mask the tail in-kernel instead,
    # saving this extra (small) read+write pass over the input.
    d_row = jnp.full((1, n_pad), r_cut, dtype).at[0, :n].set(distances)
    freq_col = jnp.zeros((r_pad, 1), frequencies.dtype).at[:num_radial, 0].set(
        frequencies)

    kernel = functools.partial(
        _distance_kernel, inv_cutoff=inv_cutoff, p=p, a=a, b=b, c=c, chunk=chunk)

    out_rn = pl.pallas_call(
        kernel,
        out_shape=jax.ShapeDtypeStruct((r_pad, n_pad), dtype),
        grid_spec=pltpu.PrefetchScalarGridSpec(
            num_scalar_prefetch=0,
            grid=grid,
            in_specs=[
                pl.BlockSpec((1, tile), lambda i: (0, i)),
                pl.BlockSpec((r_pad, 1), lambda i: (0, 0)),
            ],
            out_specs=pl.BlockSpec((r_pad, tile), lambda i: (0, i)),
        ),
        compiler_params=pltpu.CompilerParams(
            dimension_semantics=("parallel",)),
    )(d_row, freq_col)

    out_rn = out_rn[:num_radial, :n]
    if transposed:
        return out_rn                      # (num_radial, N): no extra HBM pass
    # TODO(synk): downstream consumers should take transposed=True (or fuse this layer
    # into the edge-embedding matmul) so this full-output transpose pass disappears;
    # it is kept only to match the module's (N, num_radial) contract.
    return out_rn.T


def _reference(distances, frequencies, r_cut=5.0, envelope_exponent=5):
    """Pure-JAX port of the PyTorch module (same op order: multiply by 1/r_cut)."""
    p = envelope_exponent + 1
    a = -(p + 1) * (p + 2) / 2.0
    b = p * (p + 2) * 1.0
    c = -p * (p + 1) / 2.0
    d = (distances * (1.0 / r_cut))[:, None]
    env = 1.0 / d + a * d ** (p - 1) + b * d ** p + c * d ** (p + 1)
    env = jnp.where(d < 1.0, env, 0.0)
    return env * jnp.sin(frequencies[None, :] * d)


if __name__ == "__main__":
    num_radial = 8
    r_cut = 5.0
    envelope_exponent = 5
    n_edges = 64

    key = jax.random.PRNGKey(0)
    # Distances in (0.1, 6.0): some inside, some outside the cutoff.
    distances = jax.random.uniform(
        key, (n_edges,), dtype=jnp.float32, minval=0.1, maxval=6.0)

    # Deterministic parameter init, matching nn.Parameter(pi * arange(1, R+1)).
    frequencies = jnp.float32(jnp.pi) * jnp.arange(
        1, num_radial + 1, dtype=jnp.float32)

    out = distance_layer(distances, frequencies,
                         r_cut=r_cut, envelope_exponent=envelope_exponent)
    out = jax.block_until_ready(out)

    ref = _reference(distances, frequencies, r_cut, envelope_exponent)
    assert out.shape == (n_edges, num_radial)
    assert jnp.all(jnp.isfinite(out))
    assert jnp.allclose(out, ref, atol=1e-5, rtol=1e-5)

    print("KERNEL_OK")
</pallas_src>

<mosaic_0001>
module attributes {stable_mosaic.version = 11 : i64} {
  func.func @_distance_kernel(%arg0: i32, %arg1: memref<1x128xf32, #tpu.memory_space<vmem>>, %arg2: memref<8x1xf32, #tpu.memory_space<vmem>>, %arg3: memref<8x128xf32, #tpu.memory_space<vmem>>) attributes {dimension_semantics = [#tpu.dimension_semantics<parallel>], iteration_bounds = array<i64: 1>, scalar_prefetch = 0 : i64, scratch_operands = 0 : i64, tpu.core_type = #tpu.core_type<tc>, window_params = [{transform_indices = @transform_0, window_bounds = array<i64: 1, 128>}, {pipeline_mode = #tpu.pipeline_mode<synchronous>, transform_indices = @transform_1, window_bounds = array<i64: 8, 1>}, {transform_indices = @transform_2, window_bounds = array<i64: 8, 128>}]} {
    %c0 = arith.constant 0 : index
    %c0_0 = arith.constant 0 : index
    %0 = vector.load %arg2[%c0, %c0_0] : memref<8x1xf32, #tpu.memory_space<vmem>>, vector<8x1xf32>
    %c0_i32 = arith.constant 0 : i32
    %c1_i32 = arith.constant 1 : i32
    %1 = arith.muli %c0_i32, %c1_i32 : i32
    %c0_i32_1 = arith.constant 0 : i32
    %2 = arith.addi %c0_i32_1, %1 : i32
    %c128_i32 = arith.constant 128 : i32
    %3 = arith.muli %2, %c128_i32 : i32
    %4 = tpu.assume_multiple %3, 128 : i32
    %c0_2 = arith.constant 0 : index
    %5 = arith.index_cast %4 : i32 to index
    %6 = vector.load %arg1[%c0_2, %5] : memref<1x128xf32, #tpu.memory_space<vmem>>, vector<1x128xf32>
    %cst = arith.constant 2.000000e-01 : f32
    %7 = vector.broadcast %cst : f32 to vector<1x128xf32>
    %8 = arith.mulf %6, %7 : vector<1x128xf32>
    %9 = tpu.reciprocal %8 {approx = true} : vector<1x128xf32> -> vector<1x128xf32>
    %10 = arith.mulf %8, %9 : vector<1x128xf32>
    %cst_3 = arith.constant 2.000000e+00 : f32
    %11 = vector.broadcast %cst_3 : f32 to vector<1x128xf32>
    %12 = arith.subf %11, %10 : vector<1x128xf32>
    %13 = arith.mulf %9, %12 : vector<1x128xf32>
    %14 = arith.mulf %8, %8 : vector<1x128xf32>
    %15 = arith.mulf %14, %14 : vector<1x128xf32>
    %16 = arith.mulf %8, %15 : vector<1x128xf32>
    %cst_4 = arith.constant -2.100000e+01 : f32
    %17 = vector.broadcast %cst_4 : f32 to vector<1x128xf32>
    %18 = arith.mulf %17, %8 : vector<1x128xf32>
    %cst_5 = arith.constant 4.800000e+01 : f32
    %19 = vector.broadcast %cst_5 : f32 to vector<1x128xf32>
    %20 = arith.addf %19, %18 : vector<1x128xf32>
    %21 = arith.mulf %8, %20 : vector<1x128xf32>
    %cst_6 = arith.constant -2.800000e+01 : f32
    %22 = vector.broadcast %cst_6 : f32 to vector<1x128xf32>
    %23 = arith.addf %22, %21 : vector<1x128xf32>
    %24 = arith.mulf %16, %23 : vector<1x128xf32>
    %25 = arith.addf %13, %24 : vector<1x128xf32>
    %cst_7 = arith.constant 1.000000e+00 : f32
    %26 = vector.broadcast %cst_7 : f32 to vector<1x128xf32>
    %27 = arith.cmpf olt, %8, %26 : vector<1x128xf32>
    %cst_8 = arith.constant 0.000000e+00 : f32
    %28 = vector.broadcast %cst_8 : f32 to vector<1x128xf32>
    %29 = arith.select %27, %25, %28 : vector<1x128xi1>, vector<1x128xf32>
    %cst_9 = arith.constant 1.000000e+00 : f32
    %30 = vector.broadcast %cst_9 : f32 to vector<1x128xf32>
    %31 = arith.minimumf %8, %30 : vector<1x128xf32>
    %32 = vector.broadcast %0 : vector<8x1xf32> to vector<8x128xf32>
    %33 = vector.broadcast %31 : vector<1x128xf32> to vector<8x128xf32>
    %34 = arith.mulf %32, %33 : vector<8x128xf32>
    %cst_10 = arith.constant 0.318309873 : f32
    %35 = vector.broadcast %cst_10 : f32 to vector<8x128xf32>
    %36 = arith.mulf %34, %35 : vector<8x128xf32>
    %cst_11 = arith.constant 5.000000e-01 : f32
    %37 = vector.broadcast %cst_11 : f32 to vector<8x128xf32>
    %38 = arith.addf %36, %37 : vector<8x128xf32>
    %39 = math.floor %38 : vector<8x128xf32>
    %cst_12 = arith.constant 3.140625 : f32
    %40 = vector.broadcast %cst_12 : f32 to vector<8x128xf32>
    %41 = arith.mulf %39, %40 : vector<8x128xf32>
    %42 = arith.subf %34, %41 : vector<8x128xf32>
    %cst_13 = arith.constant 9.67653584E-4 : f32
    %43 = vector.broadcast %cst_13 : f32 to vector<8x128xf32>
    %44 = arith.mulf %39, %43 : vector<8x128xf32>
    %45 = arith.subf %42, %44 : vector<8x128xf32>
    %46 = arith.mulf %45, %45 : vector<8x128xf32>
    %cst_14 = arith.constant -2.50521079E-8 : f32
    %47 = vector.broadcast %cst_14 : f32 to vector<8x128xf32>
    %48 = arith.mulf %47, %46 : vector<8x128xf32>
    %cst_15 = arith.constant 2.75573188E-6 : f32
    %49 = vector.broadcast %cst_15 : f32 to vector<8x128xf32>
    %50 = arith.addf %48, %49 : vector<8x128xf32>
    %51 = arith.mulf %50, %46 : vector<8x128xf32>
    %cst_16 = arith.constant -1.98412701E-4 : f32
    %52 = vector.broadcast %cst_16 : f32 to vector<8x128xf32>
    %53 = arith.addf %51, %52 : vector<8x128xf32>
    %54 = arith.mulf %53, %46 : vector<8x128xf32>
    %cst_17 = arith.constant 0.00833333377 : f32
    %55 = vector.broadcast %cst_17 : f32 to vector<8x128xf32>
    %56 = arith.addf %54, %55 : vector<8x128xf32>
    %57 = arith.mulf %56, %46 : vector<8x128xf32>
    %cst_18 = arith.constant -0.166666672 : f32
    %58 = vector.broadcast %cst_18 : f32 to vector<8x128xf32>
    %59 = arith.addf %57, %58 : vector<8x128xf32>
    %60 = arith.mulf %59, %46 : vector<8x128xf32>
    %cst_19 = arith.constant 1.000000e+00 : f32
    %61 = vector.broadcast %cst_19 : f32 to vector<8x128xf32>
    %62 = arith.addf %60, %61 : vector<8x128xf32>
    %63 = arith.mulf %45, %62 : vector<8x128xf32>
    %cst_20 = arith.constant 5.000000e-01 : f32
    %64 = vector.broadcast %cst_20 : f32 to vector<8x128xf32>
    %65 = arith.mulf %64, %39 : vector<8x128xf32>
    %66 = math.floor %65 : vector<8x128xf32>
    %67 = arith.subf %65, %66 : vector<8x128xf32>
    %cst_21 = arith.constant 4.000000e+00 : f32
    %68 = vector.broadcast %cst_21 : f32 to vector<8x128xf32>
    %69 = arith.mulf %68, %67 : vector<8x128xf32>
    %cst_22 = arith.constant 1.000000e+00 : f32
    %70 = vector.broadcast %cst_22 : f32 to vector<8x128xf32>
    %71 = arith.subf %70, %69 : vector<8x128xf32>
    %72 = arith.mulf %71, %63 : vector<8x128xf32>
    %73 = vector.broadcast %29 : vector<1x128xf32> to vector<8x128xf32>
    %74 = arith.mulf %73, %72 : vector<8x128xf32>
    %c0_23 = arith.constant 0 : index
    %75 = arith.index_cast %4 : i32 to index
    %76 = vector.load %arg3[%c0_23, %75] : memref<8x128xf32, #tpu.memory_space<vmem>>, vector<8x128xf32>
    tpu.vector_store %arg3[%c0_23, %75], %74 {strides = array<i32>} : memref<8x128xf32, #tpu.memory_space<vmem>>, vector<8x128xf32>,
    %c1_i32_24 = arith.constant 1 : i32
    return
  }
  func.func @transform_0(%arg0: i32) -> (i32, i32) {
    %c0_i32 = arith.constant 0 : i32
    %c0_i32_0 = arith.constant 0 : i32
    return %c0_i32, %arg0 : i32, i32
  }
  func.func @transform_1(%arg0: i32) -> (i32, i32) {
    %c0_i32 = arith.constant 0 : i32
    %c0_i32_0 = arith.constant 0 : i32
    %c0_i32_1 = arith.constant 0 : i32
    return %c0_i32, %c0_i32_0 : i32, i32
  }
  func.func @transform_2(%arg0: i32) -> (i32, i32) {
    %c0_i32 = arith.constant 0 : i32
    %c0_i32_0 = arith.constant 0 : i32
    return %c0_i32, %arg0 : i32, i32
  }
}

</mosaic_0001>

<bundles_post_ra>
// kernel: tpu_custom_call.1
= control target key start
LH: loop header
LB: loop body
LE: loop exit
PB: predicated region body
PF: predicated region fallthrough
CT: control target
= control target key end

     0   :  { %s143_s0 = inlined_call_operand.vmem [shape: f32[1,128], index: 0, kind: input, shape index: {}]   ;;  %s144_s1 = inlined_call_operand.vmem [shape: f32[8,1], index: 1, kind: input, shape index: {}]   ;;  %s145_s2 = inlined_call_operand.hbm [shape: f32[8,128], index: 2, kind: output, shape index: {}]  }
   0x1   :  { %v12_v0 = vld [vmem:[%s144_s1] sm:$0xff] }
   0x2   :  { %7 = vsyncpa [#allocation3], 0  ;;  %v117_v1 = vmov 0   ;;  %v37_v2 = vlaneseq  ;;  %v13_v3 = vld [vmem:[%s143_s0] sm:$0x1]  ;;  %s118_s0 = smov [#allocation2]  }
   0x3   :  { %92 = vset.pattern.permute.xlu0 %v117_v1  ;;  %v14_v4 = vmul.f32 0.2, %v13_v3  ;;  %s82_s1 = sshll.u32 %s118_s0, 4  ;;  %s83_s1 = int_to_ptr.vmem [resolvable:$true] %s82_s1 }
   0x4   :  { %33 = vperm.xlu0 %92, %v12_v0   ;;  %v38_v5 = vshrl.u32 %v37_v2, 7  ;;  %s95_s13 = scalar_lea.vmem %s83_s1, 128  ;;  %p100_p1 = scmp.lt.s32.totalorder %s83_s1, %s83_s1 }
   0x5   :  { %v30_v6 = vmin.f32 %v14_v4, 1.0  ;;  %93 = vrcp.f32 %v14_v4  ;;  %v22_v15 = vmul.f32 -21.0, %v14_v4  ;;  %v19_v19 = vmul.f32 %v14_v4, %v14_v4  ;;  %p96_p0 = scmp.ne.s32.totalorder %s83_s1, %s95_s13  ;;  %p101_p2 = scmp.lt.s32.totalorder %s95_s13, %s95_s13 }
   0x6   :  { %v39_v7 = vsub.s32 0, %v38_v5  ;;  %vm28_vm0 = vcmp.lt.f32.partialorder %v14_v4, 1.0 }
   0x7   :  { %v23_v20 = vadd.f32 48.0, %v22_v15  ;;  %v20_v25 = vmul.f32 %v19_v19, %v19_v19  ;;  %p102_p3 = por %p101_p2, %p100_p1 }
   0x8   :  { %v40_v8 = vrot.slane %v30_v6, %v39_v7 }
   0x9   :  { %v24_v26 = vmul.f32 %v23_v20, %v14_v4  ;;  %v21_v31 = vmul.f32 %v20_v25, %v14_v4  ;;  %p103_p4 = pnand %p102_p3, %p96_p0 }
   0xb   :  { %v25_v32 = vadd.f32 -28.0, %v24_v26 }
   0xd   :  { %v26_v37 = vmul.f32 %v25_v32, %v21_v31 }
  0x12   :  { %v94_v21 = vpop.eup %93 }
  0x13   :  { %v16_v24 = vmul.f32 %v94_v21, %v14_v4 }
  0x15   :  { %v17_v30 = vsub.f32 2.0, %v16_v24 }
  0x17   :  { %v18_v36 = vmul.f32 %v94_v21, %v17_v30 }
  0x19   :  { %v27_v41 = vadd.f32 %v26_v37, %v18_v36 }
  0x1b   :  { %v29_v45 = vsel %vm28_vm0, %v27_v41, 0.0 }
  0x1c   :  { %v72_v49 = vrot.slane %v29_v45, %v39_v7 }
  0x7f   :  { %v34_v9 = vpop.permute.xlu0 %33 }
  0x80   :  { %v42_v10 = vmul.f32 %v40_v8, %v34_v9 }
  0x82   :  { %v43_v11 = vmul.f32 0.31830987, %v42_v10 }
  0x84   :  { %v44_v12 = vadd.f32 0.5, %v43_v11 }
  0x86   :  { %v45_v13 = vfloor.f32 %v44_v12 }
  0x88   :  { %v46_v14 = vmul.f32 3.140625, %v45_v13  ;;  %v48_v17 = vmul.f32 0.0009676536, %v45_v13  ;;  %v62_v28 = vmul.f32 0.5, %v45_v13 }
  0x8a   :  { %v47_v16 = vsub.f32 %v42_v10, %v46_v14  ;;  %v63_v35 = vfloor.f32 %v62_v28 }
  0x8c   :  { %v49_v18 = vsub.f32 %v47_v16, %v48_v17  ;;  %v64_v40 = vsub.f32 %v62_v28, %v63_v35 }
  0x8e   :  { %v50_v22 = vmul.f32 %v49_v18, %v49_v18  ;;  %v65_v44 = vmul.f32 4.0, %v64_v40 }
  0x90   :  { %v51_v23 = vmul.f32 -2.5052108e-08, %v50_v22  ;;  %v66_v48 = vsub.f32 1.0, %v65_v44 }
  0x92   :  { %v52_v27 = vadd.f32 2.7557319e-06, %v51_v23 }
  0x94   :  { %v53_v29 = vmul.f32 %v52_v27, %v50_v22 }
  0x96   :  { %v54_v33 = vadd.f32 -0.0001984127, %v53_v29 }
  0x98   :  { %v55_v34 = vmul.f32 %v54_v33, %v50_v22 }
  0x9a   :  { %v56_v38 = vadd.f32 0.008333334, %v55_v34 }
  0x9c   :  { %v57_v39 = vmul.f32 %v56_v38, %v50_v22 }
  0x9e   :  { %v58_v42 = vadd.f32 -0.16666667, %v57_v39 }
  0xa0   :  { %v59_v43 = vmul.f32 %v58_v42, %v50_v22 }
  0xa2   :  { %v60_v46 = vadd.f32 1.0, %v59_v43 }
  0xa4   :  { %v61_v47 = vmul.f32 %v60_v46, %v49_v18 }
  0xa6   :  { %v67_v50 = vmul.f32 %v66_v48, %v61_v47 }
  0xa8   :  { %v74_v51 = vmul.f32 %v72_v49, %v67_v50 }
  0xaa   :  { %75 = vst [vmem:[#allocation2] sm:$0xff] %v74_v51 }
  0xab   :  { %106 = shalt.err (!%p103_p4)
}
  0xac   :  { %85 = dma.vmem_to_hbm [thread:$0]  %s83_s1, 128, %s145_s2, [#allocation3]  }
  0xad   :  { %115 = dma.done.wait [#allocation3], 128  }
  0xae   :  { %116 = vsyncadd [#allocation3], 4294967168 }
  0xaf   :  { %89 = vsyncpa [#allocation3], 1 }

</bundles_post_ra>
